<compile_context>
chip_gen: v7x
topology: tpu7x:2x2x1
jax: 0.10.0
libtpu: 0.0.40
codegen_flags: <defaults>
</compile_context>

<pallas_src>
import functools

import jax
import jax.numpy as jnp
from jax import lax
from jax.experimental import pallas as pl
from jax.experimental.pallas import tpu as pltpu

EPS = 1e-12


def _ffn_kernel(x_ref, resid_ref, w_ref, b_ref, gamma_ref, beta_ref, o_ref, acc_ref,
                *, compute_dtype):
    # x_ref:     (tm, tk)  hidden_states tile
    # resid_ref: (tm, H)   input_tensor tile (residual)
    # w_ref:     (tk, H)   dense weight in (K, N) layout, K-tiled along the leading dim
    # b_ref:     (1, H)    dense bias
    # gamma_ref: (1, H)    LayerNorm weight
    # beta_ref:  (1, H)    LayerNorm bias
    # acc_ref:   (tm, H)   f32 accumulator scratch (resident across the K axis)
    k = pl.program_id(1)

    @pl.when(k == 0)
    def _():
        # Fold dense bias + residual directly into the accumulator init: saves two full
        # (tm, H) VPU passes and a materialized temporary in the serial epilogue.
        acc_ref[...] = (resid_ref[...].astype(jnp.float32)
                        + b_ref[...].astype(jnp.float32))

    a = x_ref[...]
    w = w_ref[...]
    if compute_dtype is not None:
        a = a.astype(compute_dtype)   # bf16 MXU feed (f32 is emulated / multi-pass)
        w = w.astype(compute_dtype)   # no-op when weight was already cast at prep time

    # Canonical (M, K) x (K, N) MXU matmul with f32 accumulation.
    acc_ref[...] += jnp.dot(a, w, preferred_element_type=jnp.float32)

    @pl.when(k == pl.num_programs(1) - 1)
    def _():
        # TODO(synk): dropout is identity in eval mode; training-mode dropout would use
        # pltpu.prng_seed / pltpu.prng_random_bits with the dropout probability.
        h = acc_ref[...]
        # Single-pass LayerNorm statistics (f32, eps=1e-12).
        inv_h = jnp.float32(1.0 / h.shape[-1])
        s = jnp.sum(h, axis=-1, keepdims=True)
        s2 = jnp.sum(h * h, axis=-1, keepdims=True)
        mean = s * inv_h
        var = jnp.maximum(s2 * inv_h - mean * mean, 0.0)
        norm = (h - mean) * lax.rsqrt(var + EPS)
        out = (norm * gamma_ref[...].astype(jnp.float32)
               + beta_ref[...].astype(jnp.float32))
        o_ref[...] = out.astype(o_ref.dtype)


def _round_up(x, m):
    return (x + m - 1) // m * m


def _sublane(dtype):
    return {4: 8, 2: 16, 1: 32}.get(jnp.dtype(dtype).itemsize, 8)


def prepare_weight(w_pytorch, matmul_dtype=None):
    """One-time parameter prep: PyTorch (out_features, in_features) -> (K, N) = (in, out).

    Done once at parameter-prep time so the kernel never pays a per-call HBM transpose
    and each K-tile of the weight is a contiguous DMA.
    """
    w_kn = jnp.transpose(w_pytorch)
    if matmul_dtype is not None:
        w_kn = w_kn.astype(matmul_dtype)
    return w_kn


def feed_forward_layer(hidden_states, input_tensor, w_kn, b, gamma, beta, *,
                       tm=256, matmul_dtype=None):
    """hidden_states/input_tensor: (..., H); w_kn: (H, H) in (in, out) = (K, N) layout."""
    orig_shape = hidden_states.shape
    H = orig_shape[-1]
    assert w_kn.shape == (H, H)
    x2 = hidden_states.reshape(-1, H)
    r2 = input_tensor.reshape(-1, H)
    M = x2.shape[0]

    in_isz = x2.dtype.itemsize
    r_isz = r2.dtype.itemsize
    w_isz = w_kn.dtype.itemsize
    out_dtype = hidden_states.dtype
    out_isz = jnp.dtype(out_dtype).itemsize

    # ---- VMEM capacity (generation aware): 64 MiB/TC on v7x, 128 MiB on v5e/v6e.
    try:
        vmem_cap = int(pltpu.get_tpu_info().vmem_capacity_bytes)
    except Exception:
        vmem_cap = 64 * 1024 * 1024  # conservative (v7x-sized) fallback
    budget = int(vmem_cap * 0.75)    # leave headroom for Mosaic internal scratch

    # ---- contraction (K) tiling: keep the weight fully resident when it fits comfortably
    # (it is then fetched from HBM exactly once); otherwise tile K with lane-aligned tiles.
    # NOTE: if H has no divisor in {512, 256, 128} we fall back to a fully-resident weight.
    w_bytes = H * H * w_isz
    resident_threshold = (12 * 1024 * 1024 if vmem_cap <= 64 * 1024 * 1024
                          else 40 * 1024 * 1024)
    if w_bytes <= resident_threshold:
        tk = H
    else:
        tk = H
        for cand in (512, 256, 128):
            if H % cand == 0:
                tk = cand
                break
    num_k = H // tk

    # ---- row (M) tiling. No M % tm requirement: Pallas masks the ragged last tile.
    sub = max(_sublane(x2.dtype), _sublane(r2.dtype), _sublane(out_dtype))
    tm_req = tm
    if num_k > 1 and budget >= 80 * 1024 * 1024:
        # v5e/v6e (128 MiB VMEM): larger row tile halves weight re-streaming when K-tiled.
        tm_req = max(tm_req, 512)
    tm_eff = max(sub, min(_round_up(tm_req, sub), _round_up(M, sub)))

    # v7x megacore: the M axis is "parallel"; make sure both TensorCores get a row tile.
    if pl.cdiv(M, tm_eff) == 1 and M > sub:
        tm_eff = _round_up(-(-M // 2), sub)

    def plan_bytes(tm_, tk_):
        return (2 * tm_ * tk_ * in_isz        # hidden_states tiles (double buffered)
                + 2 * tm_ * H * r_isz         # residual tiles
                + 2 * tk_ * H * w_isz         # weight tiles
                + 2 * tm_ * H * out_isz       # output tiles
                + tm_ * H * 4                 # f32 accumulator scratch
                + 2 * 3 * H * 4)              # bias / gamma / beta

    # Shrink the row tile until the plan fits the per-generation budget (v7x: ~48 MiB).
    while tm_eff > sub and plan_bytes(tm_eff, tk) > budget:
        tm_eff = _round_up(tm_eff // 2, sub)
    # If still over budget with a tiled K axis, shrink tk (stays lane-aligned).
    while (num_k > 1 and tk > 128 and plan_bytes(tm_eff, tk) > budget
           and (tk // 2) % 128 == 0 and H % (tk // 2) == 0):
        tk //= 2
        num_k = H // tk

    num_m = pl.cdiv(M, tm_eff)
    vmem_limit = int(min(budget, max(int(plan_bytes(tm_eff, tk) * 1.25),
                                     4 * 1024 * 1024)))

    # Weight is re-streamed once per row tile only when the K axis is actually tiled
    # (with num_k == 1 its block index is constant, so Pallas fetches it once).
    weight_reads = num_m if num_k > 1 else 1
    cost = pl.CostEstimate(
        flops=2 * M * H * H,
        transcendentals=0,
        bytes_accessed=(M * H * (in_isz + r_isz + out_isz)
                        + weight_reads * H * H * w_isz
                        + 3 * H * 4),
    )

    kernel = functools.partial(_ffn_kernel, compute_dtype=matmul_dtype)

    out = pl.pallas_call(
        kernel,
        out_shape=jax.ShapeDtypeStruct((M, H), out_dtype),
        grid_spec=pltpu.PrefetchScalarGridSpec(
            num_scalar_prefetch=0,
            grid=(num_m, num_k),
            in_specs=[
                pl.BlockSpec((tm_eff, tk), lambda i, k: (i, k)),  # hidden_states tile
                pl.BlockSpec((tm_eff, H), lambda i, k: (i, 0)),   # residual tile
                pl.BlockSpec((tk, H), lambda i, k: (k, 0)),       # weight, (K, N) layout
                pl.BlockSpec((1, H), lambda i, k: (0, 0)),        # dense bias
                pl.BlockSpec((1, H), lambda i, k: (0, 0)),        # LN gamma
                pl.BlockSpec((1, H), lambda i, k: (0, 0)),        # LN beta
            ],
            out_specs=pl.BlockSpec((tm_eff, H), lambda i, k: (i, 0)),
            scratch_shapes=[pltpu.VMEM((tm_eff, H), jnp.float32)],
        ),
        compiler_params=pltpu.CompilerParams(
            dimension_semantics=("parallel", "arbitrary"),
            vmem_limit_bytes=vmem_limit,
        ),
        cost_estimate=cost,
    )(x2, r2, w_kn, b.reshape(1, H), gamma.reshape(1, H), beta.reshape(1, H))

    return out.reshape(orig_shape)


def reference(hidden_states, input_tensor, w, b, gamma, beta):
    # w in PyTorch (out, in) layout, matching nn.Linear.
    h = hidden_states @ w.T + b + input_tensor
    mean = jnp.mean(h, axis=-1, keepdims=True)
    var = jnp.mean((h - mean) ** 2, axis=-1, keepdims=True)
    return (h - mean) / jnp.sqrt(var + EPS) * gamma + beta


if __name__ == "__main__":
    key = jax.random.PRNGKey(0)
    batch, seq, hidden = 2, 8, 32
    k1, k2, k3, k4 = jax.random.split(key, 4)

    hidden_states = jax.random.normal(k1, (batch, seq, hidden), dtype=jnp.float32)
    input_tensor = jax.random.normal(k2, (batch, seq, hidden), dtype=jnp.float32)

    # Deterministic parameter init (mimics nn.Linear / nn.LayerNorm shapes).
    bound = 1.0 / (hidden ** 0.5)
    w = jax.random.uniform(k3, (hidden, hidden), minval=-bound, maxval=bound, dtype=jnp.float32)
    b = jax.random.uniform(k4, (hidden,), minval=-bound, maxval=bound, dtype=jnp.float32)
    gamma = jnp.ones((hidden,), dtype=jnp.float32)
    beta = jnp.zeros((hidden,), dtype=jnp.float32)

    ref = reference(hidden_states, input_tensor, w, b, gamma, beta)

    # Full-precision path (matches PyTorch f32 semantics).
    w_kn = prepare_weight(w)  # one-time (K, N) layout prep
    out = feed_forward_layer(hidden_states, input_tensor, w_kn, b, gamma, beta)
    out = jax.block_until_ready(out)
    assert out.shape == ref.shape
    assert jnp.allclose(out, ref, atol=1e-4, rtol=1e-4)

    # bf16 MXU fast path (f32 accumulation + f32 LayerNorm epilogue).
    w_kn_bf16 = prepare_weight(w, matmul_dtype=jnp.bfloat16)
    out_bf16 = feed_forward_layer(hidden_states, input_tensor, w_kn_bf16, b, gamma, beta,
                                  matmul_dtype=jnp.bfloat16)
    out_bf16 = jax.block_until_ready(out_bf16)
    assert out_bf16.shape == ref.shape
    assert jnp.allclose(out_bf16, ref, atol=5e-2, rtol=5e-2)

    print("KERNEL_OK")
</pallas_src>

<mosaic_0001>
module attributes {stable_mosaic.version = 11 : i64} {
  func.func @_ffn_kernel(%arg0: i32, %arg1: i32, %arg2: memref<8x32xf32, #tpu.memory_space<vmem>>, %arg3: memref<8x32xf32, #tpu.memory_space<vmem>>, %arg4: memref<32x32xf32, #tpu.memory_space<vmem>>, %arg5: memref<1x32xf32, #tpu.memory_space<vmem>>, %arg6: memref<1x32xf32, #tpu.memory_space<vmem>>, %arg7: memref<1x32xf32, #tpu.memory_space<vmem>>, %arg8: memref<8x32xf32, #tpu.memory_space<vmem>>, %arg9: memref<8x32xf32, #tpu.memory_space<vmem>>) attributes {dimension_semantics = [#tpu.dimension_semantics<parallel>, #tpu.dimension_semantics<arbitrary>], iteration_bounds = array<i64: 2, 1>, scalar_prefetch = 0 : i64, scratch_operands = 1 : i64, tpu.core_type = #tpu.core_type<tc>, window_params = [{transform_indices = @transform_0, window_bounds = array<i64: 8, 32>}, {transform_indices = @transform_1, window_bounds = array<i64: 8, 32>}, {transform_indices = @transform_2, window_bounds = array<i64: 32, 32>}, {pipeline_mode = #tpu.pipeline_mode<synchronous>, transform_indices = @transform_3, window_bounds = array<i64: 1, 32>}, {pipeline_mode = #tpu.pipeline_mode<synchronous>, transform_indices = @transform_4, window_bounds = array<i64: 1, 32>}, {pipeline_mode = #tpu.pipeline_mode<synchronous>, transform_indices = @transform_5, window_bounds = array<i64: 1, 32>}, {transform_indices = @transform_6, window_bounds = array<i64: 8, 32>}]} {
    %c0_i32 = arith.constant 0 : i32
    %0 = arith.cmpi eq, %arg1, %c0_i32 : i32
    %1 = arith.extui %0 : i1 to i32
    %c0_i32_0 = arith.constant 0 : i32
    %2 = arith.cmpi ne, %1, %c0_i32_0 : i32
    scf.if %2 {
      %c0_10 = arith.constant 0 : index
      %c0_11 = arith.constant 0 : index
      %12 = vector.load %arg3[%c0_10, %c0_11] : memref<8x32xf32, #tpu.memory_space<vmem>>, vector<8x32xf32>
      %c0_12 = arith.constant 0 : index
      %c0_13 = arith.constant 0 : index
      %13 = vector.load %arg5[%c0_12, %c0_13] : memref<1x32xf32, #tpu.memory_space<vmem>>, vector<1x32xf32>
      %14 = vector.broadcast %13 : vector<1x32xf32> to vector<8x32xf32>
      %15 = arith.addf %12, %14 : vector<8x32xf32>
      %c0_14 = arith.constant 0 : index
      %c0_15 = arith.constant 0 : index
      %16 = vector.load %arg9[%c0_14, %c0_15] : memref<8x32xf32, #tpu.memory_space<vmem>>, vector<8x32xf32>
      tpu.vector_store %arg9[%c0_14, %c0_15], %15 {strides = array<i32>} : memref<8x32xf32, #tpu.memory_space<vmem>>, vector<8x32xf32>,
    } else {
    }
    %c0 = arith.constant 0 : index
    %c0_1 = arith.constant 0 : index
    %3 = vector.load %arg2[%c0, %c0_1] : memref<8x32xf32, #tpu.memory_space<vmem>>, vector<8x32xf32>
    %c0_2 = arith.constant 0 : index
    %c0_3 = arith.constant 0 : index
    %4 = vector.load %arg4[%c0_2, %c0_3] : memref<32x32xf32, #tpu.memory_space<vmem>>, vector<32x32xf32>
    %c0_4 = arith.constant 0 : index
    %c0_5 = arith.constant 0 : index
    %5 = vector.load %arg9[%c0_4, %c0_5] : memref<8x32xf32, #tpu.memory_space<vmem>>, vector<8x32xf32>
    %cst = arith.constant dense<0.000000e+00> : vector<8x32xf32>
    %6 = tpu.matmul %3, %4, %cst {dimension_numbers = #tpu.dot_dimension_numbers<[1], [0], [0], [1], [0, 0, 1, 1], [], []>} : vector<8x32xf32>, vector<32x32xf32>, vector<8x32xf32> -> vector<8x32xf32>
    %7 = arith.addf %5, %6 : vector<8x32xf32>
    %c0_6 = arith.constant 0 : index
    %c0_7 = arith.constant 0 : index
    %8 = vector.load %arg9[%c0_6, %c0_7] : memref<8x32xf32, #tpu.memory_space<vmem>>, vector<8x32xf32>
    tpu.vector_store %arg9[%c0_6, %c0_7], %7 {strides = array<i32>} : memref<8x32xf32, #tpu.memory_space<vmem>>, vector<8x32xf32>,
    %c0_i32_8 = arith.constant 0 : i32
    %9 = arith.cmpi eq, %arg1, %c0_i32_8 : i32
    %10 = arith.extui %9 : i1 to i32
    %c0_i32_9 = arith.constant 0 : i32
    %11 = arith.cmpi ne, %10, %c0_i32_9 : i32
    scf.if %11 {
      %c0_10 = arith.constant 0 : index
      %c0_11 = arith.constant 0 : index
      %12 = vector.load %arg9[%c0_10, %c0_11] : memref<8x32xf32, #tpu.memory_space<vmem>>, vector<8x32xf32>
      %cst_12 = arith.constant dense<0.000000e+00> : vector<8xf32>
      %13 = vector.multi_reduction <add>, %12, %cst_12 [1] : vector<8x32xf32> to vector<8xf32>
      %14 = vector.shape_cast %13 : vector<8xf32> to vector<8x1xf32>
      %15 = arith.mulf %12, %12 : vector<8x32xf32>
      %cst_13 = arith.constant dense<0.000000e+00> : vector<8xf32>
      %16 = vector.multi_reduction <add>, %15, %cst_13 [1] : vector<8x32xf32> to vector<8xf32>
      %17 = vector.shape_cast %16 : vector<8xf32> to vector<8x1xf32>
      %cst_14 = arith.constant 3.125000e-02 : f32
      %18 = vector.broadcast %cst_14 : f32 to vector<8x1xf32>
      %19 = arith.mulf %14, %18 : vector<8x1xf32>
      %cst_15 = arith.constant 3.125000e-02 : f32
      %20 = vector.broadcast %cst_15 : f32 to vector<8x1xf32>
      %21 = arith.mulf %17, %20 : vector<8x1xf32>
      %22 = arith.mulf %19, %19 : vector<8x1xf32>
      %23 = arith.subf %21, %22 : vector<8x1xf32>
      %cst_16 = arith.constant 0.000000e+00 : f32
      %24 = vector.broadcast %cst_16 : f32 to vector<8x1xf32>
      %25 = arith.maximumf %23, %24 : vector<8x1xf32>
      %26 = vector.broadcast %19 : vector<8x1xf32> to vector<8x32xf32>
      %27 = arith.subf %12, %26 : vector<8x32xf32>
      %cst_17 = arith.constant 9.99999996E-13 : f32
      %28 = vector.broadcast %cst_17 : f32 to vector<8x1xf32>
      %29 = arith.addf %25, %28 : vector<8x1xf32>
      %30 = math.rsqrt %29 : vector<8x1xf32>
      %31 = vector.broadcast %30 : vector<8x1xf32> to vector<8x32xf32>
      %32 = arith.mulf %27, %31 : vector<8x32xf32>
      %c0_18 = arith.constant 0 : index
      %c0_19 = arith.constant 0 : index
      %33 = vector.load %arg6[%c0_18, %c0_19] : memref<1x32xf32, #tpu.memory_space<vmem>>, vector<1x32xf32>
      %34 = vector.broadcast %33 : vector<1x32xf32> to vector<8x32xf32>
      %35 = arith.mulf %32, %34 : vector<8x32xf32>
      %c0_20 = arith.constant 0 : index
      %c0_21 = arith.constant 0 : index
      %36 = vector.load %arg7[%c0_20, %c0_21] : memref<1x32xf32, #tpu.memory_space<vmem>>, vector<1x32xf32>
      %37 = vector.broadcast %36 : vector<1x32xf32> to vector<8x32xf32>
      %38 = arith.addf %35, %37 : vector<8x32xf32>
      %c0_22 = arith.constant 0 : index
      %c0_23 = arith.constant 0 : index
      %39 = vector.load %arg8[%c0_22, %c0_23] : memref<8x32xf32, #tpu.memory_space<vmem>>, vector<8x32xf32>
      tpu.vector_store %arg8[%c0_22, %c0_23], %38 {strides = array<i32>} : memref<8x32xf32, #tpu.memory_space<vmem>>, vector<8x32xf32>,
    } else {
    }
    return
  }
  func.func @transform_0(%arg0: i32, %arg1: i32) -> (i32, i32) {
    %c0_i32 = arith.constant 0 : i32
    return %arg0, %arg1 : i32, i32
  }
  func.func @transform_1(%arg0: i32, %arg1: i32) -> (i32, i32) {
    %c0_i32 = arith.constant 0 : i32
    %c0_i32_0 = arith.constant 0 : i32
    return %arg0, %c0_i32 : i32, i32
  }
  func.func @transform_2(%arg0: i32, %arg1: i32) -> (i32, i32) {
    %c0_i32 = arith.constant 0 : i32
    %c0_i32_0 = arith.constant 0 : i32
    return %arg1, %c0_i32 : i32, i32
  }
  func.func @transform_3(%arg0: i32, %arg1: i32) -> (i32, i32) {
    %c0_i32 = arith.constant 0 : i32
    %c0_i32_0 = arith.constant 0 : i32
    %c0_i32_1 = arith.constant 0 : i32
    return %c0_i32, %c0_i32_0 : i32, i32
  }
  func.func @transform_4(%arg0: i32, %arg1: i32) -> (i32, i32) {
    %c0_i32 = arith.constant 0 : i32
    %c0_i32_0 = arith.constant 0 : i32
    %c0_i32_1 = arith.constant 0 : i32
    return %c0_i32, %c0_i32_0 : i32, i32
  }
  func.func @transform_5(%arg0: i32, %arg1: i32) -> (i32, i32) {
    %c0_i32 = arith.constant 0 : i32
    %c0_i32_0 = arith.constant 0 : i32
    %c0_i32_1 = arith.constant 0 : i32
    return %c0_i32, %c0_i32_0 : i32, i32
  }
  func.func @transform_6(%arg0: i32, %arg1: i32) -> (i32, i32) {
    %c0_i32 = arith.constant 0 : i32
    %c0_i32_0 = arith.constant 0 : i32
    return %arg0, %c0_i32 : i32, i32
  }
}

</mosaic_0001>

<bundles_post_ra>
// kernel: tpu_custom_call.1
= control target key start
LH: loop header
LB: loop body
LE: loop exit
PB: predicated region body
PF: predicated region fallthrough
CT: control target
= control target key end

     0   :  { %s1222_s0 = inlined_call_operand.hbm [shape: f32[16,32], index: 0, kind: input, shape index: {}]   ;;  %s1223_s1 = inlined_call_operand.hbm [shape: f32[16,32], index: 1, kind: input, shape index: {}]   ;;  %s1224_s2 = inlined_call_operand.hbm [shape: f32[32,32], index: 2, kind: input, shape index: {}]   ;;  %s1225_s3 = inlined_call_operand.vmem [shape: f32[1,32], index: 3, kind: input, shape index: {}]   ;;  %s1226_s4 = inlined_call_operand.vmem [shape: f32[1,32], index: 4, kind: input, shape index: {}]   ;;  %s1227_s5 = inlined_call_operand.vmem [shape: f32[1,32], index: 5, kind: input, shape index: {}]   ;;  %s1228_s6 = inlined_call_operand.hbm [shape: f32[16,32], index: 6, kind: output, shape index: {}]  }
   0x1   :  { %1236 = sst [smem:[#allocation18_spill]] %s1224_s2 }
   0x2   :  { %11 = vsyncpa [#allocation4], 0 }
   0x3   :  { %13 = vsyncpa [#allocation4 + $0x1], 0 }
   0x4   :  { %14 = vsyncpa [#allocation7], 0 }
   0x5   :  { %16 = vsyncpa [#allocation7 + $0x1], 0 }
   0x6   :  { %17 = vsyncpa [#allocation5], 0 }
   0x7   :  { %19 = vsyncpa [#allocation5 + $0x1], 0  ;;  %s956_s21 = smov 0   ;;  %s958_s22 = smov 0  }
   0x8   :  { %s960_s23 = smov 0   ;;  %s962_s24 = smov 0  }
   0x9   :  { %s964_s25 = smov 0   ;;  %s966_s26 = smov 0  }
   0xa LB: > { %1237 = sst [smem:[#allocation14_spill]] %s898_s23  ;;  %s987_s27 = sadd.s32 4294967295, %s910_s26   ;;  %s910_s26 = sphi %s966_s26, %s25_s26   ;;  %s906_s25 = sphi %s964_s25, %s1260_s25   ;;  %s902_s24 = sphi %s962_s24, %s1259_s24   ;;  %s898_s23 = sphi %s960_s23, %s1258_s23   ;;  %s894_s22 = sphi %s958_s22, %s1262_s22   ;;  %s890_s21 = sphi %s956_s21, %s1261_s21  }
   0xb   : > { %1238 = sst [smem:[#allocation15_spill]] %s906_s25  ;;  %s604_s28 = sadd.s32 4294967294, %s910_s26  }
   0xc   : > { %p59_p0 = scmp.ne.s32.totalorder %s894_s22, %s890_s21  ;;  %p1229_p1 = scmp.eq.s32.totalorder %s987_s27, 0 }
   0xd   : > { %p204_p3 = scmp.eq.s32.totalorder %s604_s28, 1  ;;  %p605_p5 = scmp.ge.s32.totalorder %s910_s26, 1 }
   0xe   : > { %p996_p4 = por %p1229_p1, %p59_p0  ;;  %p211_p7 = scmp.lt.s32.totalorder %s910_s26, 3 }
   0xf   : > { %p1001_p6 = por %p204_p3, %p59_p0  ;;  %s912_s8 = smov [#allocation8]  }
  0x10   : > { %s1239_s29 = scalar_select %p996_p4, 1, 0 }
  0x11   : > { %s1240_s30 = scalar_select %p1001_p6, 1, 0 }
  0x12   : > { %p1006_p8 = pnand %p605_p5, %p211_p7  ;;  %s226_s9 = sshll.u32 %s912_s8, 4  ;;  %s227_s9 = int_to_ptr.vmem [resolvable:$true] %s226_s9 }
  0x13   : > { %s37_s11 = sadd.s32 1, %s906_s25  ;;  %s1243_s2 = sld [smem:[#allocation18_spill]] }
  0x14   : > { %s1241_s7 = scalar_select %p1006_p8, 1, 0 }
  0x15   : > { %p657_p9 = pneg %p1006_p8 }
  0x17   : > { %p1015_p11 = pnand %p657_p9, %p1229_p1 }
  0x19   : > { %s732_s14 = scalar_lea.hbm %s1243_s2, 512  ;;  %p734_p13 = pneg %p1015_p11 }
  0x1a   : > { %p733_p12 = scmp.ne.s32.totalorder %s1243_s2, %s732_s14  ;;  %p739_p5 = scmp.lt.u32.totalorder %s732_s14, %s1243_s2 }
  0x1c   : > { %p735_p0 = pnand %p734_p13, %p733_p12 }
  0x1e   : > { %p736_p3 = pneg %p735_p0 }
  0x20   : > { %p741_p7 = pnand %p739_p5, %p736_p3 }
  0x22   : > { %744 = shalt.err (!%p741_p7)
}
  0x23   : > { %s745_s19 = scalar_lea.vmem %s227_s9, 512  ;;  %p753_p2 = scmp.lt.s32.totalorder %s227_s9, %s227_s9 }
  0x24   : > { %p746_p9 = scmp.ne.s32.totalorder %s227_s9, %s745_s19  ;;  %p754_p6 = scmp.lt.s32.totalorder %s745_s19, %s745_s19 }
  0x26   : > { %p748_p10 = pnand %p746_p9, %p734_p13  ;;  %p755_p4 = por %p754_p6, %p753_p2 }
  0x28   : > { %p749_p1 = pneg %p748_p10 }
  0x2a   : > { %p756_p8 = pnand %p755_p4, %p749_p1 }
  0x2c   : > { %759 = shalt.err (!%p756_p8)
}
  0x2d   : > { %s913_s20 = smov 128   ;;  %s914_s28 = smov 8  }
  0x2e   : > { %660 = dma.hbm_to_vmem [thread:$0]  (!%p1015_p11), %s1243_s2, 512, %s227_s9, [#allocation7], %s913_s20, %s913_s20, %s914_s28  }
  0x2f   : > { %p39_p1 = scmp.ge.s32.totalorder %s37_s11, 2  ;;  %s46_s13 = sadd.s32 1, %s898_s23 }
  0x30   : > { %p53_p2 = scmp.ne.s32.totalorder %s898_s23, %s894_s22  ;;  %p54_p4 = scmp.eq.s32.totalorder %s910_s26, 0 }
  0x31   : > { %s1264_s11 = smov (%p39_p1, %s37_s11), 0  ;;  %p1246_p8 = scmp.eq.s32.totalorder %s987_s27, 1 }
  0x32   : > { %1244 = sst [smem:[#allocation16_spill]] %s1264_s11  ;;  %p1042_p6 = por %p54_p4, %p53_p2 }
  0x33   : > { %p1048_p10 = por %p1246_p8, %p53_p2  ;;  %s41_s15 = ssub.s32 %s906_s25, %s1264_s11 }
  0x34   : > { %p673_p11 = scmp.lt.s32.totalorder %s910_s26, 2  ;;  %p44_p12 = scmp.eq.s32.totalorder %s41_s15, 0 }
  0x35   : > { %s1247_s10 = scalar_select %p1048_p10, 1, 0 }
  0x36   : > { %s249_s9 = sand.u32 1, %s898_s23   ;;  %s609_s18 = sshll.u32 %s906_s25, 7 }
  0x37   : > { %s1056_s16 = sshll.u32 %s249_s9, 3  ;;  %s1065_s28 = scalar_lea.hbm %s1222_s0, %s609_s18 }
  0x38   : > { %s1059_s17 = scalar_select %p44_p12, %s898_s23, %s46_s13  }
  0x39   : > { %s253_s8 = scalar_lea.vmem [#allocation3], %s1056_s16  ;;  %p1072_p13 = pnand %p673_p11, %p1042_p6 }
  0x3a   : > { %1248 = sst [smem:[#allocation17_spill]] %s1059_s17  ;;  %s261_s12 = sshll.u32 %s253_s8, 4  ;;  %s1068_s12 = int_to_ptr.vmem [resolvable:$true] %s261_s12 }
  0x3b   : > { %s1079_s19 = scalar_lea.hbm %s1223_s1, %s609_s18  ;;  %s268_s20 = sand.u32 1, %s910_s26  }
  0x3c   : > { %s250_s11 = scalar_lea.sflag [#allocation4], %s249_s9  ;;  %s760_s25 = scalar_lea.hbm %s1065_s28, 128 }
  0x3d   : > { %p761_p0 = scmp.ne.s32.totalorder %s1065_s28, %s760_s25  ;;  %p762_p3 = pneg %p1072_p13 }
  0x3e   : > { %s765_s17 = scalar_lea.hbm %s1222_s0, 256  ;;  %p766_p9 = scmp.lt.u32.totalorder %s1065_s28, %s1222_s0 }
  0x3f   : > { %p763_p5 = pnand %p762_p3, %p761_p0  ;;  %p767_p1 = scmp.lt.u32.totalorder %s765_s17, %s760_s25 }
  0x40   : > { %p769_p4 = scmp.lt.u32.totalorder %s760_s25, %s1065_s28 }
  0x41   : > { %p764_p7 = pneg %p763_p5  ;;  %p768_p2 = por %p767_p1, %p766_p9 }
  0x43   : > { %p770_p6 = por %p769_p4, %p768_p2 }
  0x45   : > { %p771_p8 = pnand %p770_p6, %p764_p7 }
  0x47   : > { %774 = shalt.err (!%p771_p8)
}
  0x48   : > { %s775_s9 = scalar_lea.vmem %s1068_s12, 128  ;;  %s915_s18 = smov [#allocation3]  }
  0x49   : > { %p776_p11 = scmp.ne.s32.totalorder %s1068_s12, %s775_s9  ;;  %s780_s13 = sshll.u32 %s915_s18, 4  ;;  %s781_s13 = int_to_ptr.vmem [resolvable:$false] %s780_s13 }
  0x4a   : > { %s782_s23 = scalar_lea.vmem %s781_s13, 256  ;;  %p783_p5 = scmp.lt.s32.totalorder %s1068_s12, %s781_s13 }
  0x4b   : > { %p778_p12 = pnand %p776_p11, %p762_p3  ;;  %p784_p9 = scmp.lt.s32.totalorder %s782_s23, %s775_s9 }
  0x4d   : > { %p779_p0 = pneg %p778_p12  ;;  %p785_p1 = por %p784_p9, %p783_p5 }
  0x4f   : > { %p786_p2 = pnand %p785_p1, %p779_p0 }
  0x51   : > { %789 = shalt.err (!%p786_p2)
}
  0x52   : > { %664 = dma.hbm_to_vmem [thread:$0]  (!%p1072_p13), %s1065_s28, 128, %s1068_s12, %s250_s11  }
  0x53   : > { %s272_s25 = scalar_lea.vmem [#allocation6], %s1056_s16  ;;  %s269_s14 = scalar_lea.sflag [#allocation7], %s268_s20 }
  0x54   : > { %s279_s17 = sshll.u32 %s272_s25, 4  ;;  %s790_s8 = scalar_lea.hbm %s1079_s19, 128  ;;  %s280_s17 = int_to_ptr.vmem [resolvable:$true] %s279_s17 }
  0x55   : > { %p791_p7 = scmp.ne.s32.totalorder %s1079_s19, %s790_s8  ;;  %s795_s18 = scalar_lea.hbm %s1223_s1, 256 }
  0x56   : > { %p796_p8 = scmp.lt.u32.totalorder %s1079_s19, %s1223_s1  ;;  %p797_p11 = scmp.lt.u32.totalorder %s795_s18, %s790_s8 }
  0x57   : > { %p793_p4 = pnand %p791_p7, %p762_p3  ;;  %p799_p0 = scmp.lt.u32.totalorder %s790_s8, %s1079_s19 }
  0x58   : > { %p798_p12 = por %p797_p11, %p796_p8 }
  0x59   : > { %p794_p6 = pneg %p793_p4 }
  0x5a   : > { %p800_p5 = por %p799_p0, %p798_p12 }
  0x5c   : > { %p801_p9 = pnand %p800_p5, %p794_p6 }
  0x5e   : > { %804 = shalt.err (!%p801_p9)
}
  0x5f   : > { %s805_s11 = scalar_lea.vmem %s280_s17, 128  ;;  %s916_s16 = smov [#allocation6]  }
  0x60   : > { %p806_p1 = scmp.ne.s32.totalorder %s280_s17, %s805_s11  ;;  %s810_s28 = sshll.u32 %s916_s16, 4  ;;  %s811_s28 = int_to_ptr.vmem [resolvable:$false] %s810_s28 }
  0x61   : > { %s812_s12 = scalar_lea.vmem %s811_s28, 256  ;;  %p813_p4 = scmp.lt.s32.totalorder %s280_s17, %s811_s28 }
  0x62   : > { %p808_p2 = pnand %p806_p1, %p762_p3  ;;  %p814_p10 = scmp.lt.s32.totalorder %s812_s12, %s805_s11 }
  0x64   : > { %p809_p7 = pneg %p808_p2  ;;  %p815_p8 = por %p814_p10, %p813_p4 }
  0x66   : > { %p816_p11 = pnand %p815_p8, %p809_p7 }
  0x68   : > { %819 = shalt.err (!%p816_p11)
}
  0x69   : > { %667 = dma.hbm_to_vmem [thread:$0]  (!%p1072_p13), %s1079_s19, 128, %s280_s17, %s269_s14  }
  0x6a   : > { %p1250_p6 = scmp.ne.s32.totalorder %s1241_s7, 0 }
  0x6b   : > { %s1132_s20 = sand.u32 (!%p1250_p6), 1, %s894_s22   ;;  %p1251_p10 = scmp.ne.s32.totalorder (!%p1250_p6), %s1239_s29, 0 }
  0x6c   : > { %288 = sbr.rel (%p1250_p6) target bundleno = 540 (0x21c), region = 44  ;;  %s1135_s25 = sshll.u32 (!%p1250_p6), %s1132_s20, 3 }
  0x6d   : > { %s291_s8 = scalar_lea.sflag (!%p1250_p6), [#allocation4], %s1132_s20  ;;  %s294_s2 = scalar_lea.vmem (!%p1250_p6), [#allocation3], %s1135_s25 }
  0x73   : > { %873 = dma.done.wait (%p1251_p10), %s291_s8, 128  }
  0x74   : > { %875 = vsyncadd (%p1251_p10), %s291_s8, 4294967168  ;;  %s299_s7 = sand.u32 1, %s987_s27   ;;  %s303_s19 = scalar_lea.vmem [#allocation6], %s1135_s25 }
  0x75   : > { %s300_s15 = scalar_lea.sflag [#allocation7], %s299_s7 }
  0x76   : > { %877 = dma.done.wait (%p1251_p10), %s300_s15, 128  }
  0x77   : > { %879 = vsyncadd (%p1251_p10), %s300_s15, 4294967168  ;;  %p1252_p13 = scmp.eq.s32.totalorder %s987_s27, 0 }
  0x79   : > { %881 = dma.done.wait (%p1252_p13), [#allocation7], 512   ;;  %p1253_p3 = pmov %p1252_p13 }
  0x7a   : > { %v917_v0 = vmov 0.0|0.0   ;;  %vm918_vm0 = vmmov 0   ;;  %v919_v1 = vmov 0.0   ;;  %v358_v2 = vld [vmem:[#allocation8] sm:$0xff]  ;;  %v359_v3 = vld [vmem:[#allocation8 + $0x8] sm:$0xff]  ;;  %v360_v4 = vld [vmem:[#allocation8 + $0x10] sm:$0xff] }
  0x7b   : > { %883 = vsyncadd (%p1253_p3), [#allocation7], 4294966784  ;;  %641 = vmatprep.subr.bf16.mxu0 %v917_v0  ;;  %638 = vmatprep.mubr.msk.f32.mxu0 %vm918_vm0, %v919_v1  ;;  %v642_v5 = vpack.c.bf16 %v359_v3, %v358_v2  ;;  %v361_v6 = vld [vmem:[#allocation8 + $0x18] sm:$0xff]  ;;  %vm355_vm1 = vcmask 261120   ;;  %v357_v11 = vld [vmem:[%s294_s2] sm:$0xff]  ;;  %s622_s13 = sshll.u32 %s902_s24, 7 }
  0x7c   : > { %v346_v7 = vld [vmem:[%s303_s19] sm:$0xff]  ;;  %v645_v9 = vpack.c.bf16 %v361_v6, %v360_v4  ;;  %s340_s23 = scalar_lea.vmem [#allocation9], %s1135_s25  ;;  %s1172_s12 = scalar_lea.hbm %s1228_s6, %s622_s13 }
  0x7d   : > { %v617_v8 = vld [vmem:[%s1225_s3] ss:$0 sm:$0xff]  ;;  %643 = vmatpush3.bf16.msra.mxu0 %v642_v5  ;;  %s490_s11 = sshll.u32 %s340_s23, 4  ;;  %s477_s8 = scalar_lea.sflag [#allocation5], %s1132_s20  ;;  %s1174_s11 = int_to_ptr.vmem [resolvable:$true] %s490_s11 }
  0x7e   : > { %v354_v10 = vadd.f32 %v617_v8, %v346_v7  ;;  %644 = vmatprep.subr.bf16.mxu0 %v917_v0  ;;  %v619_v30 = vld [vmem:[%s1226_s4] ss:$0 sm:$0xff]  ;;  %s820_s2 = scalar_lea.vmem %s1174_s11, 128  ;;  %p1254_p0 = scmp.ne.s32.totalorder %s1247_s10, 0 }
  0x7f   : > { %v620_v32 = vld [vmem:[%s1227_s5] ss:$0 sm:$0xff]  ;;  %p821_p12 = scmp.ne.s32.totalorder %s1174_s11, %s820_s2  ;;  %s920_s24 = smov [#allocation9]  }
  0x80   : > { %356 = vst.msk [vmem:[#allocation2] sm:$0xff] %vm355_vm1, %v354_v10  ;;  %s824_s25 = sshll.u32 %s920_s24, 4  ;;  %s825_s25 = int_to_ptr.vmem [resolvable:$false] %s824_s25 }
  0x81   : > { %646 = vmatpush3.bf16.msra.mxu0 %v645_v9  ;;  %p822_p5 = pnand %p821_p12, %p1254_p0  ;;  %s826_s7 = scalar_lea.vmem %s825_s25, 256 }
  0x82   : > { %p827_p1 = scmp.lt.s32.totalorder %s1174_s11, %s825_s25  ;;  %p828_p2 = scmp.lt.s32.totalorder %s826_s7, %s820_s2 }
  0x83   : > { %p823_p9 = pneg %p822_p5 }
  0x84   : > { %639 = vmatmul.mubr.msk.f32.vlgmr.msra.gmra.mrb[0].mxu0 %vm355_vm1, %v357_v11  ;;  %p829_p7 = por %p828_p2, %p827_p1 }
  0x86   : > { %p830_p4 = pnand %p829_p7, %p823_p9 }
  0x87   : > { %v362_v12 = vld [vmem:[#allocation2] sm:$0xff] }
 0x157   : > { %v433_v13 = vpop.f32.mrb[0].mxu0 }
 0x158   : > { %v437_v14 = vadd.f32 %v433_v13, %v362_v12  ;;  %v640_v15 = vpop.f32.mrb[1].mxu0 }
 0x15a   : > { %438 = vst.msk [vmem:[#allocation2] sm:$0xff] %vm355_vm1, %v437_v14 }
 0x161   : > { %v442_v16 = vld [vmem:[#allocation2] sm:$0xff] }
 0x162   : > { %v443_v17 = vsel %vm355_vm1, %v442_v16, 0.0  ;;  %v446_v18 = vmul.f32 %v442_v16, %v442_v16 }
 0x163   : > { %444 = vadd.xlane.f32.xlu0 %v443_v17 }
 0x164   : > { %v447_v19 = vsel %vm355_vm1, %v446_v18, 0.0 }
 0x167   : > { %448 = vadd.xlane.f32.xlu0 %v447_v19 }
 0x1f0   : > { %v445_v20 = vpop.xlane.xlu0 %444 }
 0x1f1   : > { %v450_v21 = vmul.f32 0.03125, %v445_v20 }
 0x1f3   : > { %v452_v23 = vmul.f32 %v450_v21, %v450_v21  ;;  %v455_v28 = vsub.f32 %v442_v16, %v450_v21 }
 0x1f4   : > { %v449_v22 = vpop.xlane.xlu0 %448 }
 0x1f5   : > { %v451_v24 = vmul.f32 0.03125, %v449_v22 }
 0x1f7   : > { %v453_v25 = vsub.f32 %v451_v24, %v452_v23 }
 0x1f9   : > { %v454_v26 = vmax.f32 %v453_v25, 0.0 }
 0x1fb   : > { %v456_v27 = vadd.f32 1e-12, %v454_v26 }
 0x1fd   : > { %730 = vrsqrt.f32 %v456_v27 }
 0x207   : > { %v731_v29 = vpop.eup %730 }
 0x208   : > { %v458_v31 = vmul.f32 %v731_v29, %v455_v28 }
 0x20a   : > { %v466_v33 = vmul.f32 %v619_v30, %v458_v31 }
 0x20c   : > { %v474_v34 = vadd.f32 %v620_v32, %v466_v33 }
 0x20e   : > { %475 = vst.msk [vmem:[%s340_s23] sm:$0xff] %vm355_vm1, %v474_v34 }
 0x20f   : > { %833 = shalt.err (!%p830_p4)
}
 0x210   : > { %s834_s20 = scalar_lea.hbm %s1172_s12, 128  ;;  %s838_s17 = scalar_lea.hbm %s1228_s6, 256 }
 0x211   : > { %p835_p8 = scmp.ne.s32.totalorder %s1172_s12, %s834_s20  ;;  %p839_p10 = scmp.lt.u32.totalorder %s1172_s12, %s1228_s6 }
 0x212   : > { %p840_p13 = scmp.lt.u32.totalorder %s838_s17, %s834_s20  ;;  %p842_p12 = scmp.lt.u32.totalorder %s834_s20, %s1172_s12 }
 0x213   : > { %p836_p11 = pnand %p835_p8, %p1254_p0 }
 0x214   : > { %p841_p3 = por %p840_p13, %p839_p10 }
 0x215   : > { %p837_p6 = pneg %p836_p11 }
 0x216   : > { %p843_p5 = por %p842_p12, %p841_p3 }
 0x218   : > { %p844_p9 = pnand %p843_p5, %p837_p6 }
 0x21a   : > { %847 = shalt.err (!%p844_p9)
}
 0x21b   : > { %655 = dma.vmem_to_hbm [thread:$0]  (%p1254_p0), %s1174_s11, 128, %s1172_s12, %s477_s8  }
 0x21c PF: > { %s502_s14 = sand.u32 1, %s890_s21   ;;  %p1255_p1 = scmp.ne.s32.totalorder %s1240_s30, 0 }
 0x21d   : > { %p1256_p2 = scmp.ge.s32.totalorder %s910_s26, 2  ;;  %s503_s9 = scalar_lea.sflag [#allocation5], %s502_s14 }
 0x21f   : > { %p669_p7 = pnand %p1256_p2, %p1255_p1 }
 0x221   : > { %885 = dma.done.wait (!%p669_p7), %s503_s9, 128  }
 0x222   : > { %887 = vsyncadd (!%p669_p7), %s503_s9, 4294967168  ;;  %s25_s26 = sadd.s32 1, %s910_s26   ;;  %s1257_s18 = sld [smem:[#allocation14_spill]] }
 0x223   : > { %p22_p4 = scmp.ge.s32.totalorder %s25_s26, 4   ;;  %s1258_s23 = sld [smem:[#allocation17_spill]] }
 0x224   : > { %s1259_s24 = sld [smem:[#allocation15_spill]]  ;;  %s1260_s25 = sld [smem:[#allocation16_spill]] }
 0x225   : > { %s1261_s21 = smov %s894_s22  ;;  %24 = sbr.rel (!%p22_p4) target bundleno = 10 (0xa), region = 115 }
 0x228   : > { %s1262_s22 = smov %s1257_s18 }
 0x22c   :  { %508 = vsyncpa [#allocation4], 1 }
 0x22d   :  { %510 = vsyncpa [#allocation4 + $0x1], 1 }
 0x22e   :  { %511 = vsyncpa [#allocation7], 1 }
 0x22f   :  { %513 = vsyncpa [#allocation7 + $0x1], 1 }
 0x230   :  { %514 = vsyncpa [#allocation5], 1 }
 0x231   :  { %516 = vsyncpa [#allocation5 + $0x1], 1 }

</bundles_post_ra>
